<compile_context>
chip_gen: v7x
topology: tpu7x:2x2x1
jax: 0.10.0
libtpu: 0.0.40
codegen_flags: <defaults>
</compile_context>

<pallas_src>
import functools
import math

import jax
import jax.numpy as jnp
from jax import lax
from jax.experimental import pallas as pl
from jax.experimental.pallas import tpu as pltpu


# Contract the last dim of both operands (x @ W.T / q @ k.T without
# materializing a transpose; the MXU consumes the operand directly).
_CONTRACT_LAST = (((1,), (1,)), ((), ()))


def _fused_self_attention_kernel(xq_ref, xk_ref, xv_ref,
                                 wq_ref, wk_ref, wv_ref, wo_ref, bo_ref,
                                 o_ref, *, heads):
    xq = xq_ref[...]                       # (tm, E)  bf16 query-row tile
    xk = xk_ref[...]                       # (Lk, E)  bf16
    xv = xv_ref[...]                       # (Lv, E)  bf16

    acc = jnp.zeros(o_ref.shape, jnp.float32)   # lane-dense (tm, E) accumulator

    # Unrolled trace-time loop over heads.  Each head contributes
    #   acc += softmax(q_h k_h^T / sqrt(E)) v_h @ Wo[:, h*hd:(h+1)*hd].T
    # so fc_out is fused and the kernel writes the (tm, E) block exactly once.
    for h in range(heads):
        # Per-head projections; weights pre-split (and Wq pre-scaled) in the
        # wrapper, so these are plain bf16 MXU matmuls with f32 accumulation.
        q_h = lax.dot_general(xq, wq_ref[h], _CONTRACT_LAST,
                              preferred_element_type=jnp.float32)     # (tm, hd)
        k_h = lax.dot_general(xk, wk_ref[h], _CONTRACT_LAST,
                              preferred_element_type=jnp.float32)     # (Lk, hd)
        v_h = lax.dot_general(xv, wv_ref[h], _CONTRACT_LAST,
                              preferred_element_type=jnp.float32)     # (Lv, hd)

        # energy = (q / sqrt(E)) k^T  -- scale already folded into Wq.
        energy = lax.dot_general(q_h.astype(jnp.bfloat16),
                                 k_h.astype(jnp.bfloat16),
                                 _CONTRACT_LAST,
                                 preferred_element_type=jnp.float32)  # (tm, Lk)

        # f32 softmax over keys; normalization deferred past the PV matmul so
        # the elementwise work is (tm, hd) instead of (tm, Lk).
        m = jnp.max(energy, axis=-1, keepdims=True)
        p = jnp.exp(energy - m)
        denom = jnp.sum(p, axis=-1, keepdims=True)

        pv = jnp.dot(p.astype(jnp.bfloat16), v_h.astype(jnp.bfloat16),
                     preferred_element_type=jnp.float32)              # (tm, hd)
        o_h = pv / denom                                              # exact

        # Fused fc_out: accumulate o_h @ Wo[:, h*hd:(h+1)*hd].T into (tm, E).
        acc = acc + lax.dot_general(o_h.astype(jnp.bfloat16), wo_ref[h],
                                    _CONTRACT_LAST,
                                    preferred_element_type=jnp.float32)

    o_ref[...] = acc + bo_ref[...]         # broadcast (1, E) bias, write once


def self_attention_pallas(xv, xk, xq, Wv, Wk, Wq, Wo, bo, *, heads):
    Lv, E = xv.shape
    Lk = xk.shape[0]
    Lq = xq.shape[0]
    assert E % heads == 0, "Embedding size needs to be divisible by heads"
    assert Lv == Lk, "values and keys must have the same length"
    hd = E // heads

    # ---- weight-load-time prep (zero per-step kernel cost) -----------------
    # PyTorch Linear: y = x @ W.T.  Rows h*hd:(h+1)*hd of Wq/Wk/Wv produce
    # head h, so a row-wise reshape gives (heads, hd, E) per-head weights.
    # fc_out consumes concat columns h*hd:(h+1)*hd -> columns of Wo.
    scale = 1.0 / math.sqrt(float(E))      # module scales by sqrt(embed_size)
    wq_h = (Wq * scale).reshape(heads, hd, E).astype(jnp.bfloat16)
    wk_h = Wk.reshape(heads, hd, E).astype(jnp.bfloat16)
    wv_h = Wv.reshape(heads, hd, E).astype(jnp.bfloat16)
    wo_h = Wo.reshape(E, heads, hd).transpose(1, 0, 2).astype(jnp.bfloat16)
    bo2 = bo.reshape(1, E).astype(jnp.float32)

    # Pre-cast activations to bf16 (halves input DMA, removes in-kernel casts).
    xq_b = xq.astype(jnp.bfloat16)
    xk_b = xk.astype(jnp.bfloat16)
    xv_b = xv.astype(jnp.bfloat16)

    # ---- query-row tiling ---------------------------------------------------
    tm = Lq if Lq <= 256 else 256
    assert Lq % tm == 0, "demo wrapper assumes Lq divisible by the row tile"
    grid = (Lq // tm,)

    flops = 2 * E * E * (Lq + Lk + Lv) + 4 * Lq * Lk * E + 2 * Lq * E * E
    bytes_accessed = (2 * ((Lq + Lk + Lv) * E + 4 * E * E)   # bf16 inputs
                      + 4 * E + 4 * Lq * E)                   # f32 bias + out

    return pl.pallas_call(
        functools.partial(_fused_self_attention_kernel, heads=heads),
        out_shape=jax.ShapeDtypeStruct((Lq, E), jnp.float32),
        grid=grid,
        in_specs=[
            pl.BlockSpec((tm, E), lambda i: (i, 0)),             # xq tile
            pl.BlockSpec((Lk, E), lambda i: (0, 0)),             # xk (full)
            pl.BlockSpec((Lv, E), lambda i: (0, 0)),             # xv (full)
            pl.BlockSpec((heads, hd, E), lambda i: (0, 0, 0)),   # Wq (scaled)
            pl.BlockSpec((heads, hd, E), lambda i: (0, 0, 0)),   # Wk
            pl.BlockSpec((heads, hd, E), lambda i: (0, 0, 0)),   # Wv
            pl.BlockSpec((heads, E, hd), lambda i: (0, 0, 0)),   # Wo columns
            pl.BlockSpec((1, E), lambda i: (0, 0)),              # bias
        ],
        out_specs=pl.BlockSpec((tm, E), lambda i: (i, 0)),
        compiler_params=pltpu.CompilerParams(
            dimension_semantics=("parallel",)),
        cost_estimate=pl.CostEstimate(
            flops=flops,
            transcendentals=heads * Lq * Lk,
            bytes_accessed=bytes_accessed),
    )(xq_b, xk_b, xv_b, wq_h, wk_h, wv_h, wo_h, bo2)


def self_attention_ref(xv, xk, xq, Wv, Wk, Wq, Wo, bo, *, heads):
    """Pure-JAX reference mirroring the PyTorch module (f32 throughout)."""
    Lq, E = xq.shape
    hd = E // heads
    v = (xv @ Wv.T).reshape(xv.shape[0], heads, hd)
    k = (xk @ Wk.T).reshape(xk.shape[0], heads, hd)
    q = (xq @ Wq.T).reshape(Lq, heads, hd)
    energy = jnp.einsum('qhd,khd->hqk', q, k)
    attn = jax.nn.softmax(energy / math.sqrt(E), axis=2)
    out = jnp.einsum('hql,lhd->qhd', attn, v).reshape(Lq, heads * hd)
    return out @ Wo.T + bo


if __name__ == "__main__":
    embed_size, heads = 32, 4
    value_len, key_len, query_len = 8, 8, 8

    key = jax.random.PRNGKey(0)
    ks = jax.random.split(key, 8)
    xv = jax.random.normal(ks[0], (value_len, embed_size), jnp.float32)
    xk = jax.random.normal(ks[1], (key_len, embed_size), jnp.float32)
    xq = jax.random.normal(ks[2], (query_len, embed_size), jnp.float32)

    # PyTorch-style uniform(-1/sqrt(in), 1/sqrt(in)) parameter init.
    bound = 1.0 / math.sqrt(embed_size)
    Wv = jax.random.uniform(ks[3], (embed_size, embed_size), jnp.float32, -bound, bound)
    Wk = jax.random.uniform(ks[4], (embed_size, embed_size), jnp.float32, -bound, bound)
    Wq = jax.random.uniform(ks[5], (embed_size, embed_size), jnp.float32, -bound, bound)
    Wo = jax.random.uniform(ks[6], (embed_size, embed_size), jnp.float32, -bound, bound)
    bo = jax.random.uniform(ks[7], (embed_size,), jnp.float32, -bound, bound)

    out = self_attention_pallas(xv, xk, xq, Wv, Wk, Wq, Wo, bo, heads=heads)
    out = jax.block_until_ready(out)

    ref = self_attention_ref(xv, xk, xq, Wv, Wk, Wq, Wo, bo, heads=heads)
    assert out.shape == (query_len, embed_size)
    # Tolerance accounts for bf16 matmul operands (f32 MXU accumulation and an
    # exact f32 softmax/divide keep the error comfortably under this).
    assert jnp.allclose(out, ref, atol=3e-2, rtol=3e-2), "mismatch vs reference"

    print("KERNEL_OK")
</pallas_src>

<mosaic_0001>
module attributes {stable_mosaic.version = 11 : i64} {
  func.func @_fused_self_attention_kernel(%arg0: i32, %arg1: memref<8x32xbf16, #tpu.memory_space<vmem>>, %arg2: memref<8x32xbf16, #tpu.memory_space<vmem>>, %arg3: memref<8x32xbf16, #tpu.memory_space<vmem>>, %arg4: memref<4x8x32xbf16, #tpu.memory_space<vmem>>, %arg5: memref<4x8x32xbf16, #tpu.memory_space<vmem>>, %arg6: memref<4x8x32xbf16, #tpu.memory_space<vmem>>, %arg7: memref<4x32x8xbf16, #tpu.memory_space<vmem>>, %arg8: memref<1x32xf32, #tpu.memory_space<vmem>>, %arg9: memref<8x32xf32, #tpu.memory_space<vmem>>) attributes {dimension_semantics = [#tpu.dimension_semantics<parallel>], iteration_bounds = array<i64: 1>, scalar_prefetch = 0 : i64, scratch_operands = 0 : i64, tpu.core_type = #tpu.core_type<tc>, window_params = [{transform_indices = @transform_0, window_bounds = array<i64: 8, 32>}, {pipeline_mode = #tpu.pipeline_mode<synchronous>, transform_indices = @transform_1, window_bounds = array<i64: 8, 32>}, {pipeline_mode = #tpu.pipeline_mode<synchronous>, transform_indices = @transform_2, window_bounds = array<i64: 8, 32>}, {pipeline_mode = #tpu.pipeline_mode<synchronous>, transform_indices = @transform_3, window_bounds = array<i64: 4, 8, 32>}, {pipeline_mode = #tpu.pipeline_mode<synchronous>, transform_indices = @transform_4, window_bounds = array<i64: 4, 8, 32>}, {pipeline_mode = #tpu.pipeline_mode<synchronous>, transform_indices = @transform_5, window_bounds = array<i64: 4, 8, 32>}, {pipeline_mode = #tpu.pipeline_mode<synchronous>, transform_indices = @transform_6, window_bounds = array<i64: 4, 32, 8>}, {pipeline_mode = #tpu.pipeline_mode<synchronous>, transform_indices = @transform_7, window_bounds = array<i64: 1, 32>}, {transform_indices = @transform_8, window_bounds = array<i64: 8, 32>}]} {
    %c0 = arith.constant 0 : index
    %c0_0 = arith.constant 0 : index
    %0 = vector.load %arg1[%c0, %c0_0] : memref<8x32xbf16, #tpu.memory_space<vmem>>, vector<8x32xbf16>
    %c0_1 = arith.constant 0 : index
    %c0_2 = arith.constant 0 : index
    %1 = vector.load %arg2[%c0_1, %c0_2] : memref<8x32xbf16, #tpu.memory_space<vmem>>, vector<8x32xbf16>
    %c0_3 = arith.constant 0 : index
    %c0_4 = arith.constant 0 : index
    %2 = vector.load %arg3[%c0_3, %c0_4] : memref<8x32xbf16, #tpu.memory_space<vmem>>, vector<8x32xbf16>
    %cst = arith.constant 0.000000e+00 : f32
    %3 = vector.broadcast %cst : f32 to vector<8x32xf32>
    %c0_5 = arith.constant 0 : index
    %c0_6 = arith.constant 0 : index
    %c0_7 = arith.constant 0 : index
    %4 = vector.load %arg4[%c0_5, %c0_6, %c0_7] : memref<4x8x32xbf16, #tpu.memory_space<vmem>>, vector<1x8x32xbf16>
    %5 = vector.shape_cast %4 : vector<1x8x32xbf16> to vector<8x32xbf16>
    %cst_8 = arith.constant dense<0.000000e+00> : vector<8x8xf32>
    %6 = tpu.matmul %0, %5, %cst_8 {dimension_numbers = #tpu.dot_dimension_numbers<[1], [1], [0], [0], [0, 0, 1, 0], [], []>} : vector<8x32xbf16>, vector<8x32xbf16>, vector<8x8xf32> -> vector<8x8xf32>
    %c0_9 = arith.constant 0 : index
    %c0_10 = arith.constant 0 : index
    %c0_11 = arith.constant 0 : index
    %7 = vector.load %arg5[%c0_9, %c0_10, %c0_11] : memref<4x8x32xbf16, #tpu.memory_space<vmem>>, vector<1x8x32xbf16>
    %8 = vector.shape_cast %7 : vector<1x8x32xbf16> to vector<8x32xbf16>
    %cst_12 = arith.constant dense<0.000000e+00> : vector<8x8xf32>
    %9 = tpu.matmul %1, %8, %cst_12 {dimension_numbers = #tpu.dot_dimension_numbers<[1], [1], [0], [0], [0, 0, 1, 0], [], []>} : vector<8x32xbf16>, vector<8x32xbf16>, vector<8x8xf32> -> vector<8x8xf32>
    %c0_13 = arith.constant 0 : index
    %c0_14 = arith.constant 0 : index
    %c0_15 = arith.constant 0 : index
    %10 = vector.load %arg6[%c0_13, %c0_14, %c0_15] : memref<4x8x32xbf16, #tpu.memory_space<vmem>>, vector<1x8x32xbf16>
    %11 = vector.shape_cast %10 : vector<1x8x32xbf16> to vector<8x32xbf16>
    %cst_16 = arith.constant dense<0.000000e+00> : vector<8x8xf32>
    %12 = tpu.matmul %2, %11, %cst_16 {dimension_numbers = #tpu.dot_dimension_numbers<[1], [1], [0], [0], [0, 0, 1, 0], [], []>} : vector<8x32xbf16>, vector<8x32xbf16>, vector<8x8xf32> -> vector<8x8xf32>
    %13 = arith.truncf %6 : vector<8x8xf32> to vector<8x8xbf16>
    %14 = arith.truncf %9 : vector<8x8xf32> to vector<8x8xbf16>
    %cst_17 = arith.constant dense<0.000000e+00> : vector<8x8xf32>
    %15 = tpu.matmul %13, %14, %cst_17 {dimension_numbers = #tpu.dot_dimension_numbers<[1], [1], [0], [0], [0, 0, 1, 0], [], []>} : vector<8x8xbf16>, vector<8x8xbf16>, vector<8x8xf32> -> vector<8x8xf32>
    %cst_18 = arith.constant dense<0xFF800000> : vector<8xf32>
    %16 = vector.multi_reduction <maximumf>, %15, %cst_18 [1] : vector<8x8xf32> to vector<8xf32>
    %17 = vector.shape_cast %16 : vector<8xf32> to vector<8x1xf32>
    %18 = vector.broadcast %17 : vector<8x1xf32> to vector<8x8xf32>
    %19 = arith.subf %15, %18 : vector<8x8xf32>
    %20 = math.exp %19 : vector<8x8xf32>
    %cst_19 = arith.constant dense<0.000000e+00> : vector<8xf32>
    %21 = vector.multi_reduction <add>, %20, %cst_19 [1] : vector<8x8xf32> to vector<8xf32>
    %22 = vector.shape_cast %21 : vector<8xf32> to vector<8x1xf32>
    %23 = arith.truncf %20 : vector<8x8xf32> to vector<8x8xbf16>
    %24 = arith.truncf %12 : vector<8x8xf32> to vector<8x8xbf16>
    %cst_20 = arith.constant dense<0.000000e+00> : vector<8x8xf32>
    %25 = tpu.matmul %23, %24, %cst_20 {dimension_numbers = #tpu.dot_dimension_numbers<[1], [0], [0], [1], [0, 0, 1, 1], [], []>} : vector<8x8xbf16>, vector<8x8xbf16>, vector<8x8xf32> -> vector<8x8xf32>
    %26 = vector.broadcast %22 : vector<8x1xf32> to vector<8x8xf32>
    %27 = arith.divf %25, %26 : vector<8x8xf32>
    %28 = arith.truncf %27 : vector<8x8xf32> to vector<8x8xbf16>
    %c0_21 = arith.constant 0 : index
    %c0_22 = arith.constant 0 : index
    %c0_23 = arith.constant 0 : index
    %29 = vector.load %arg7[%c0_21, %c0_22, %c0_23] : memref<4x32x8xbf16, #tpu.memory_space<vmem>>, vector<1x32x8xbf16>
    %30 = vector.shape_cast %29 : vector<1x32x8xbf16> to vector<32x8xbf16>
    %cst_24 = arith.constant dense<0.000000e+00> : vector<8x32xf32>
    %31 = tpu.matmul %28, %30, %cst_24 {dimension_numbers = #tpu.dot_dimension_numbers<[1], [1], [0], [0], [0, 0, 1, 0], [], []>} : vector<8x8xbf16>, vector<32x8xbf16>, vector<8x32xf32> -> vector<8x32xf32>
    %32 = arith.addf %3, %31 : vector<8x32xf32>
    %c1 = arith.constant 1 : index
    %c0_25 = arith.constant 0 : index
    %c0_26 = arith.constant 0 : index
    %33 = vector.load %arg4[%c1, %c0_25, %c0_26] : memref<4x8x32xbf16, #tpu.memory_space<vmem>>, vector<1x8x32xbf16>
    %34 = vector.shape_cast %33 : vector<1x8x32xbf16> to vector<8x32xbf16>
    %cst_27 = arith.constant dense<0.000000e+00> : vector<8x8xf32>
    %35 = tpu.matmul %0, %34, %cst_27 {dimension_numbers = #tpu.dot_dimension_numbers<[1], [1], [0], [0], [0, 0, 1, 0], [], []>} : vector<8x32xbf16>, vector<8x32xbf16>, vector<8x8xf32> -> vector<8x8xf32>
    %c1_28 = arith.constant 1 : index
    %c0_29 = arith.constant 0 : index
    %c0_30 = arith.constant 0 : index
    %36 = vector.load %arg5[%c1_28, %c0_29, %c0_30] : memref<4x8x32xbf16, #tpu.memory_space<vmem>>, vector<1x8x32xbf16>
    %37 = vector.shape_cast %36 : vector<1x8x32xbf16> to vector<8x32xbf16>
    %cst_31 = arith.constant dense<0.000000e+00> : vector<8x8xf32>
    %38 = tpu.matmul %1, %37, %cst_31 {dimension_numbers = #tpu.dot_dimension_numbers<[1], [1], [0], [0], [0, 0, 1, 0], [], []>} : vector<8x32xbf16>, vector<8x32xbf16>, vector<8x8xf32> -> vector<8x8xf32>
    %c1_32 = arith.constant 1 : index
    %c0_33 = arith.constant 0 : index
    %c0_34 = arith.constant 0 : index
    %39 = vector.load %arg6[%c1_32, %c0_33, %c0_34] : memref<4x8x32xbf16, #tpu.memory_space<vmem>>, vector<1x8x32xbf16>
    %40 = vector.shape_cast %39 : vector<1x8x32xbf16> to vector<8x32xbf16>
    %cst_35 = arith.constant dense<0.000000e+00> : vector<8x8xf32>
    %41 = tpu.matmul %2, %40, %cst_35 {dimension_numbers = #tpu.dot_dimension_numbers<[1], [1], [0], [0], [0, 0, 1, 0], [], []>} : vector<8x32xbf16>, vector<8x32xbf16>, vector<8x8xf32> -> vector<8x8xf32>
    %42 = arith.truncf %35 : vector<8x8xf32> to vector<8x8xbf16>
    %43 = arith.truncf %38 : vector<8x8xf32> to vector<8x8xbf16>
    %cst_36 = arith.constant dense<0.000000e+00> : vector<8x8xf32>
    %44 = tpu.matmul %42, %43, %cst_36 {dimension_numbers = #tpu.dot_dimension_numbers<[1], [1], [0], [0], [0, 0, 1, 0], [], []>} : vector<8x8xbf16>, vector<8x8xbf16>, vector<8x8xf32> -> vector<8x8xf32>
    %cst_37 = arith.constant dense<0xFF800000> : vector<8xf32>
    %45 = vector.multi_reduction <maximumf>, %44, %cst_37 [1] : vector<8x8xf32> to vector<8xf32>
    %46 = vector.shape_cast %45 : vector<8xf32> to vector<8x1xf32>
    %47 = vector.broadcast %46 : vector<8x1xf32> to vector<8x8xf32>
    %48 = arith.subf %44, %47 : vector<8x8xf32>
    %49 = math.exp %48 : vector<8x8xf32>
    %cst_38 = arith.constant dense<0.000000e+00> : vector<8xf32>
    %50 = vector.multi_reduction <add>, %49, %cst_38 [1] : vector<8x8xf32> to vector<8xf32>
    %51 = vector.shape_cast %50 : vector<8xf32> to vector<8x1xf32>
    %52 = arith.truncf %49 : vector<8x8xf32> to vector<8x8xbf16>
    %53 = arith.truncf %41 : vector<8x8xf32> to vector<8x8xbf16>
    %cst_39 = arith.constant dense<0.000000e+00> : vector<8x8xf32>
    %54 = tpu.matmul %52, %53, %cst_39 {dimension_numbers = #tpu.dot_dimension_numbers<[1], [0], [0], [1], [0, 0, 1, 1], [], []>} : vector<8x8xbf16>, vector<8x8xbf16>, vector<8x8xf32> -> vector<8x8xf32>
    %55 = vector.broadcast %51 : vector<8x1xf32> to vector<8x8xf32>
    %56 = arith.divf %54, %55 : vector<8x8xf32>
    %57 = arith.truncf %56 : vector<8x8xf32> to vector<8x8xbf16>
    %c1_40 = arith.constant 1 : index
    %c0_41 = arith.constant 0 : index
    %c0_42 = arith.constant 0 : index
    %58 = vector.load %arg7[%c1_40, %c0_41, %c0_42] : memref<4x32x8xbf16, #tpu.memory_space<vmem>>, vector<1x32x8xbf16>
    %59 = vector.shape_cast %58 : vector<1x32x8xbf16> to vector<32x8xbf16>
    %cst_43 = arith.constant dense<0.000000e+00> : vector<8x32xf32>
    %60 = tpu.matmul %57, %59, %cst_43 {dimension_numbers = #tpu.dot_dimension_numbers<[1], [1], [0], [0], [0, 0, 1, 0], [], []>} : vector<8x8xbf16>, vector<32x8xbf16>, vector<8x32xf32> -> vector<8x32xf32>
    %61 = arith.addf %32, %60 : vector<8x32xf32>
    %c2 = arith.constant 2 : index
    %c0_44 = arith.constant 0 : index
    %c0_45 = arith.constant 0 : index
    %62 = vector.load %arg4[%c2, %c0_44, %c0_45] : memref<4x8x32xbf16, #tpu.memory_space<vmem>>, vector<1x8x32xbf16>
    %63 = vector.shape_cast %62 : vector<1x8x32xbf16> to vector<8x32xbf16>
    %cst_46 = arith.constant dense<0.000000e+00> : vector<8x8xf32>
    %64 = tpu.matmul %0, %63, %cst_46 {dimension_numbers = #tpu.dot_dimension_numbers<[1], [1], [0], [0], [0, 0, 1, 0], [], []>} : vector<8x32xbf16>, vector<8x32xbf16>, vector<8x8xf32> -> vector<8x8xf32>
    %c2_47 = arith.constant 2 : index
    %c0_48 = arith.constant 0 : index
    %c0_49 = arith.constant 0 : index
    %65 = vector.load %arg5[%c2_47, %c0_48, %c0_49] : memref<4x8x32xbf16, #tpu.memory_space<vmem>>, vector<1x8x32xbf16>
    %66 = vector.shape_cast %65 : vector<1x8x32xbf16> to vector<8x32xbf16>
    %cst_50 = arith.constant dense<0.000000e+00> : vector<8x8xf32>
    %67 = tpu.matmul %1, %66, %cst_50 {dimension_numbers = #tpu.dot_dimension_numbers<[1], [1], [0], [0], [0, 0, 1, 0], [], []>} : vector<8x32xbf16>, vector<8x32xbf16>, vector<8x8xf32> -> vector<8x8xf32>
    %c2_51 = arith.constant 2 : index
    %c0_52 = arith.constant 0 : index
    %c0_53 = arith.constant 0 : index
    %68 = vector.load %arg6[%c2_51, %c0_52, %c0_53] : memref<4x8x32xbf16, #tpu.memory_space<vmem>>, vector<1x8x32xbf16>
    %69 = vector.shape_cast %68 : vector<1x8x32xbf16> to vector<8x32xbf16>
    %cst_54 = arith.constant dense<0.000000e+00> : vector<8x8xf32>
    %70 = tpu.matmul %2, %69, %cst_54 {dimension_numbers = #tpu.dot_dimension_numbers<[1], [1], [0], [0], [0, 0, 1, 0], [], []>} : vector<8x32xbf16>, vector<8x32xbf16>, vector<8x8xf32> -> vector<8x8xf32>
    %71 = arith.truncf %64 : vector<8x8xf32> to vector<8x8xbf16>
    %72 = arith.truncf %67 : vector<8x8xf32> to vector<8x8xbf16>
    %cst_55 = arith.constant dense<0.000000e+00> : vector<8x8xf32>
    %73 = tpu.matmul %71, %72, %cst_55 {dimension_numbers = #tpu.dot_dimension_numbers<[1], [1], [0], [0], [0, 0, 1, 0], [], []>} : vector<8x8xbf16>, vector<8x8xbf16>, vector<8x8xf32> -> vector<8x8xf32>
    %cst_56 = arith.constant dense<0xFF800000> : vector<8xf32>
    %74 = vector.multi_reduction <maximumf>, %73, %cst_56 [1] : vector<8x8xf32> to vector<8xf32>
    %75 = vector.shape_cast %74 : vector<8xf32> to vector<8x1xf32>
    %76 = vector.broadcast %75 : vector<8x1xf32> to vector<8x8xf32>
    %77 = arith.subf %73, %76 : vector<8x8xf32>
    %78 = math.exp %77 : vector<8x8xf32>
    %cst_57 = arith.constant dense<0.000000e+00> : vector<8xf32>
    %79 = vector.multi_reduction <add>, %78, %cst_57 [1] : vector<8x8xf32> to vector<8xf32>
    %80 = vector.shape_cast %79 : vector<8xf32> to vector<8x1xf32>
    %81 = arith.truncf %78 : vector<8x8xf32> to vector<8x8xbf16>
    %82 = arith.truncf %70 : vector<8x8xf32> to vector<8x8xbf16>
    %cst_58 = arith.constant dense<0.000000e+00> : vector<8x8xf32>
    %83 = tpu.matmul %81, %82, %cst_58 {dimension_numbers = #tpu.dot_dimension_numbers<[1], [0], [0], [1], [0, 0, 1, 1], [], []>} : vector<8x8xbf16>, vector<8x8xbf16>, vector<8x8xf32> -> vector<8x8xf32>
    %84 = vector.broadcast %80 : vector<8x1xf32> to vector<8x8xf32>
    %85 = arith.divf %83, %84 : vector<8x8xf32>
    %86 = arith.truncf %85 : vector<8x8xf32> to vector<8x8xbf16>
    %c2_59 = arith.constant 2 : index
    %c0_60 = arith.constant 0 : index
    %c0_61 = arith.constant 0 : index
    %87 = vector.load %arg7[%c2_59, %c0_60, %c0_61] : memref<4x32x8xbf16, #tpu.memory_space<vmem>>, vector<1x32x8xbf16>
    %88 = vector.shape_cast %87 : vector<1x32x8xbf16> to vector<32x8xbf16>
    %cst_62 = arith.constant dense<0.000000e+00> : vector<8x32xf32>
    %89 = tpu.matmul %86, %88, %cst_62 {dimension_numbers = #tpu.dot_dimension_numbers<[1], [1], [0], [0], [0, 0, 1, 0], [], []>} : vector<8x8xbf16>, vector<32x8xbf16>, vector<8x32xf32> -> vector<8x32xf32>
    %90 = arith.addf %61, %89 : vector<8x32xf32>
    %c3 = arith.constant 3 : index
    %c0_63 = arith.constant 0 : index
    %c0_64 = arith.constant 0 : index
    %91 = vector.load %arg4[%c3, %c0_63, %c0_64] : memref<4x8x32xbf16, #tpu.memory_space<vmem>>, vector<1x8x32xbf16>
    %92 = vector.shape_cast %91 : vector<1x8x32xbf16> to vector<8x32xbf16>
    %cst_65 = arith.constant dense<0.000000e+00> : vector<8x8xf32>
    %93 = tpu.matmul %0, %92, %cst_65 {dimension_numbers = #tpu.dot_dimension_numbers<[1], [1], [0], [0], [0, 0, 1, 0], [], []>} : vector<8x32xbf16>, vector<8x32xbf16>, vector<8x8xf32> -> vector<8x8xf32>
    %c3_66 = arith.constant 3 : index
    %c0_67 = arith.constant 0 : index
    %c0_68 = arith.constant 0 : index
    %94 = vector.load %arg5[%c3_66, %c0_67, %c0_68] : memref<4x8x32xbf16, #tpu.memory_space<vmem>>, vector<1x8x32xbf16>
    %95 = vector.shape_cast %94 : vector<1x8x32xbf16> to vector<8x32xbf16>
    %cst_69 = arith.constant dense<0.000000e+00> : vector<8x8xf32>
    %96 = tpu.matmul %1, %95, %cst_69 {dimension_numbers = #tpu.dot_dimension_numbers<[1], [1], [0], [0], [0, 0, 1, 0], [], []>} : vector<8x32xbf16>, vector<8x32xbf16>, vector<8x8xf32> -> vector<8x8xf32>
    %c3_70 = arith.constant 3 : index
    %c0_71 = arith.constant 0 : index
    %c0_72 = arith.constant 0 : index
    %97 = vector.load %arg6[%c3_70, %c0_71, %c0_72] : memref<4x8x32xbf16, #tpu.memory_space<vmem>>, vector<1x8x32xbf16>
    %98 = vector.shape_cast %97 : vector<1x8x32xbf16> to vector<8x32xbf16>
    %cst_73 = arith.constant dense<0.000000e+00> : vector<8x8xf32>
    %99 = tpu.matmul %2, %98, %cst_73 {dimension_numbers = #tpu.dot_dimension_numbers<[1], [1], [0], [0], [0, 0, 1, 0], [], []>} : vector<8x32xbf16>, vector<8x32xbf16>, vector<8x8xf32> -> vector<8x8xf32>
    %100 = arith.truncf %93 : vector<8x8xf32> to vector<8x8xbf16>
    %101 = arith.truncf %96 : vector<8x8xf32> to vector<8x8xbf16>
    %cst_74 = arith.constant dense<0.000000e+00> : vector<8x8xf32>
    %102 = tpu.matmul %100, %101, %cst_74 {dimension_numbers = #tpu.dot_dimension_numbers<[1], [1], [0], [0], [0, 0, 1, 0], [], []>} : vector<8x8xbf16>, vector<8x8xbf16>, vector<8x8xf32> -> vector<8x8xf32>
    %cst_75 = arith.constant dense<0xFF800000> : vector<8xf32>
    %103 = vector.multi_reduction <maximumf>, %102, %cst_75 [1] : vector<8x8xf32> to vector<8xf32>
    %104 = vector.shape_cast %103 : vector<8xf32> to vector<8x1xf32>
    %105 = vector.broadcast %104 : vector<8x1xf32> to vector<8x8xf32>
    %106 = arith.subf %102, %105 : vector<8x8xf32>
    %107 = math.exp %106 : vector<8x8xf32>
    %cst_76 = arith.constant dense<0.000000e+00> : vector<8xf32>
    %108 = vector.multi_reduction <add>, %107, %cst_76 [1] : vector<8x8xf32> to vector<8xf32>
    %109 = vector.shape_cast %108 : vector<8xf32> to vector<8x1xf32>
    %110 = arith.truncf %107 : vector<8x8xf32> to vector<8x8xbf16>
    %111 = arith.truncf %99 : vector<8x8xf32> to vector<8x8xbf16>
    %cst_77 = arith.constant dense<0.000000e+00> : vector<8x8xf32>
    %112 = tpu.matmul %110, %111, %cst_77 {dimension_numbers = #tpu.dot_dimension_numbers<[1], [0], [0], [1], [0, 0, 1, 1], [], []>} : vector<8x8xbf16>, vector<8x8xbf16>, vector<8x8xf32> -> vector<8x8xf32>
    %113 = vector.broadcast %109 : vector<8x1xf32> to vector<8x8xf32>
    %114 = arith.divf %112, %113 : vector<8x8xf32>
    %115 = arith.truncf %114 : vector<8x8xf32> to vector<8x8xbf16>
    %c3_78 = arith.constant 3 : index
    %c0_79 = arith.constant 0 : index
    %c0_80 = arith.constant 0 : index
    %116 = vector.load %arg7[%c3_78, %c0_79, %c0_80] : memref<4x32x8xbf16, #tpu.memory_space<vmem>>, vector<1x32x8xbf16>
    %117 = vector.shape_cast %116 : vector<1x32x8xbf16> to vector<32x8xbf16>
    %cst_81 = arith.constant dense<0.000000e+00> : vector<8x32xf32>
    %118 = tpu.matmul %115, %117, %cst_81 {dimension_numbers = #tpu.dot_dimension_numbers<[1], [1], [0], [0], [0, 0, 1, 0], [], []>} : vector<8x8xbf16>, vector<32x8xbf16>, vector<8x32xf32> -> vector<8x32xf32>
    %119 = arith.addf %90, %118 : vector<8x32xf32>
    %c0_82 = arith.constant 0 : index
    %c0_83 = arith.constant 0 : index
    %120 = vector.load %arg8[%c0_82, %c0_83] : memref<1x32xf32, #tpu.memory_space<vmem>>, vector<1x32xf32>
    %121 = vector.broadcast %120 : vector<1x32xf32> to vector<8x32xf32>
    %122 = arith.addf %119, %121 : vector<8x32xf32>
    %c0_84 = arith.constant 0 : index
    %c0_85 = arith.constant 0 : index
    %123 = vector.load %arg9[%c0_84, %c0_85] : memref<8x32xf32, #tpu.memory_space<vmem>>, vector<8x32xf32>
    tpu.vector_store %arg9[%c0_84, %c0_85], %122 {strides = array<i32>} : memref<8x32xf32, #tpu.memory_space<vmem>>, vector<8x32xf32>,
    return
  }
  func.func @transform_0(%arg0: i32) -> (i32, i32) {
    %c0_i32 = arith.constant 0 : i32
    %c0_i32_0 = arith.constant 0 : i32
    return %arg0, %c0_i32 : i32, i32
  }
  func.func @transform_1(%arg0: i32) -> (i32, i32) {
    %c0_i32 = arith.constant 0 : i32
    %c0_i32_0 = arith.constant 0 : i32
    %c0_i32_1 = arith.constant 0 : i32
    return %c0_i32, %c0_i32_0 : i32, i32
  }
  func.func @transform_2(%arg0: i32) -> (i32, i32) {
    %c0_i32 = arith.constant 0 : i32
    %c0_i32_0 = arith.constant 0 : i32
    %c0_i32_1 = arith.constant 0 : i32
    return %c0_i32, %c0_i32_0 : i32, i32
  }
  func.func @transform_3(%arg0: i32) -> (i32, i32, i32) {
    %c0_i32 = arith.constant 0 : i32
    %c0_i32_0 = arith.constant 0 : i32
    %c0_i32_1 = arith.constant 0 : i32
    %c0_i32_2 = arith.constant 0 : i32
    return %c0_i32, %c0_i32_0, %c0_i32_1 : i32, i32, i32
  }
  func.func @transform_4(%arg0: i32) -> (i32, i32, i32) {
    %c0_i32 = arith.constant 0 : i32
    %c0_i32_0 = arith.constant 0 : i32
    %c0_i32_1 = arith.constant 0 : i32
    %c0_i32_2 = arith.constant 0 : i32
    return %c0_i32, %c0_i32_0, %c0_i32_1 : i32, i32, i32
  }
  func.func @transform_5(%arg0: i32) -> (i32, i32, i32) {
    %c0_i32 = arith.constant 0 : i32
    %c0_i32_0 = arith.constant 0 : i32
    %c0_i32_1 = arith.constant 0 : i32
    %c0_i32_2 = arith.constant 0 : i32
    return %c0_i32, %c0_i32_0, %c0_i32_1 : i32, i32, i32
  }
  func.func @transform_6(%arg0: i32) -> (i32, i32, i32) {
    %c0_i32 = arith.constant 0 : i32
    %c0_i32_0 = arith.constant 0 : i32
    %c0_i32_1 = arith.constant 0 : i32
    %c0_i32_2 = arith.constant 0 : i32
    return %c0_i32, %c0_i32_0, %c0_i32_1 : i32, i32, i32
  }
  func.func @transform_7(%arg0: i32) -> (i32, i32) {
    %c0_i32 = arith.constant 0 : i32
    %c0_i32_0 = arith.constant 0 : i32
    %c0_i32_1 = arith.constant 0 : i32
    return %c0_i32, %c0_i32_0 : i32, i32
  }
  func.func @transform_8(%arg0: i32) -> (i32, i32) {
    %c0_i32 = arith.constant 0 : i32
    %c0_i32_0 = arith.constant 0 : i32
    return %arg0, %c0_i32 : i32, i32
  }
}

</mosaic_0001>

<bundles_post_ra>
// kernel: tpu_custom_call.1
= control target key start
LH: loop header
LB: loop body
LE: loop exit
PB: predicated region body
PF: predicated region fallthrough
CT: control target
= control target key end

     0   :  { %vm35_vm0 = vcmask 261120   ;;  %v1604_v1 = vmov 0.0   ;;  %vm1605_vm1 = vmmov 0   ;;  %s1894_s0 = inlined_call_operand.vmem [shape: bf16[8,32], index: 0, kind: input, shape index: {}]   ;;  %s1895_s1 = inlined_call_operand.vmem [shape: bf16[8,32], index: 1, kind: input, shape index: {}]   ;;  %s1896_s2 = inlined_call_operand.vmem [shape: bf16[8,32], index: 2, kind: input, shape index: {}]   ;;  %s1897_s3 = inlined_call_operand.vmem [shape: bf16[4,8,32], index: 3, kind: input, shape index: {}]   ;;  %s1898_s4 = inlined_call_operand.vmem [shape: bf16[4,8,32], index: 4, kind: input, shape index: {}]   ;;  %s1899_s5 = inlined_call_operand.vmem [shape: bf16[4,8,32], index: 5, kind: input, shape index: {}]   ;;  %s1900_s6 = inlined_call_operand.vmem [shape: bf16[4,32,8], index: 6, kind: input, shape index: {}]   ;;  %s1901_s7 = inlined_call_operand.vmem [shape: f32[1,32], index: 7, kind: input, shape index: {}]   ;;  %s1902_s8 = inlined_call_operand.hbm [shape: f32[8,32], index: 8, kind: output, shape index: {}]  }
   0x1   :  { %v34_v0 = vld [vmem:[%s1897_s3] sm:$0xf]  ;;  %1401 = vmatprep.subr.bf16.mxu1 %v1604_v1  ;;  %1403 = vmatprep.mubr.msk.bf16.mxu1 %vm1605_vm1, %v1604_v1 }
   0x2   :  { %v40_v2 = vsel %vm35_vm0, %v34_v0, 0  ;;  %v82_v3 = vld [vmem:[%s1898_s4] sm:$0xf]  ;;  %1413 = vmatprep.subr.bf16.mxu0 %v1604_v1  ;;  %1415 = vmatprep.mubr.msk.bf16.mxu0 %vm1605_vm1, %v1604_v1 }
   0x3   :  { %1402 = vmatpush3.bf16.xpose.msra.mxu1 %v40_v2  ;;  %v87_v4 = vsel %vm35_vm0, %v82_v3, 0  ;;  %v1670_v5 = vld [vmem:[%s1894_s0] sm:$0xf] }
   0x4   :  { %1407 = vmatprep.subr.bf16.mxu1 %v1604_v1 }
   0x5   :  { %13 = vsyncpa [#allocation3], 0  ;;  %v1680_v6 = vld [vmem:[%s1895_s1] sm:$0xf]  ;;  %vm178_vm2 = vcmask 64512   ;;  %vm239_vm3 = vcmask 1043456  }
   0x6   :  { %v129_v7 = vld [vmem:[%s1899_s5] sm:$0xf]  ;;  %v1300_v32 = vld [vmem:[%s1897_s3 + $0x4] sm:$0xf] }
   0x7   :  { %v134_v8 = vsel %vm35_vm0, %v129_v7, 0  ;;  %v1694_v9 = vld [vmem:[%s1896_s2] sm:$0xf]  ;;  %v293_v33 = vsel %vm35_vm0, %v1300_v32, 0  ;;  %v1302_v37 = vld [vmem:[%s1898_s4 + $0x4] sm:$0xf] }
   0x8   :  { %1414 = vmatpush3.bf16.xpose.msra.mxu0 %v134_v8  ;;  %v338_v41 = vsel %vm35_vm0, %v1302_v37, 0  ;;  %v1304_v46 = vld [vmem:[%s1899_s5 + $0x4] sm:$0xf] }
   0x9   :  { %1425 = vmatprep.subr.bf16.mxu0 %v1604_v1  ;;  %v383_v47 = vsel %vm35_vm0, %v1304_v46, 0 }
   0xa   :  { %1404 = vmatmul.mubr.msk.bf16.vlgmr.msra.gmra.mrb[0].mxu1 %vm35_vm0, %v1670_v5 }
   0xb   :  { %1408 = vmatpush3.bf16.xpose.msra.mxu1 %v87_v4  ;;  %1409 = vmatprep.mubr.msk.bf16.mxu1 %vm1605_vm1, %v1604_v1 }
   0xc   :  { %1419 = vmatprep.subr.bf16.mxu1 %v1604_v1 }
   0xf   :  { %1416 = vmatmul.mubr.msk.bf16.vlgmr.msra.gmra.mrb[0].mxu0 %vm35_vm0, %v1694_v9 }
  0x10   :  { %1427 = vmatprep.mubr.msk.bf16.mxu0 %vm1605_vm1, %v1604_v1 }
  0x12   :  { %1410 = vmatmul.mubr.msk.bf16.vlgmr.msra.gmra.mrb[4].mxu1 %vm35_vm0, %v1680_v6 }
  0x13   :  { %1421 = vmatprep.mubr.msk.bf16.mxu1 %vm1605_vm1, %v1604_v1 }
  0xdd   :  { %v76_v10 = vpop.f32.mrb[0].mxu1 }
  0xde   :  { %v1405_v11 = vpop.f32.mrb[1].mxu1  ;;  %v176_v20 = vpack.c.bf16 %v76_v10, %v76_v10 }
  0xdf   :  { %v79_v12 = vpop.f32.mrb[2].mxu1 }
  0xe0   :  { %v1406_v13 = vpop.f32.mrb[3].mxu1 }
  0xe1   :  { %v1556_v13 = vld [vmem:[%s1900_s6] sm:$0xff]  }
  0xe2   :  { %v170_v26 = vpop.f32.mrb[0].mxu0 }
  0xe3   :  { %v1417_v27 = vpop.f32.mrb[1].mxu0  ;;  %v235_v28 = vpack.c.bf16 %v170_v26, %v170_v26 }
  0xe4   :  { %v173_v29 = vpop.f32.mrb[2].mxu0 }
  0xe5   :  { %v123_v14 = vpop.f32.mrb[4].mxu1  ;;  %v1418_v30 = vpop.f32.mrb[3].mxu0  ;;  %v241_v31 = vsel %vm239_vm3, %v235_v28, 0  ;;  %v1559_v28 = vld [vmem:[%s1900_s6 + $0x18] sm:$0xff]  }
  0xe6   :  { %v177_v15 = vpack.c.bf16 %v123_v14, %v123_v14  ;;  %v1411_v16 = vpop.f32.mrb[5].mxu1  ;;  %1426 = vmatpush3.bf16.msra.mxu0 %v241_v31  ;;  %v555_v29 = vsel %vm178_vm2, %v1559_v28, 0 }
  0xe7   :  { %v126_v17 = vpop.f32.mrb[6].mxu1  ;;  %1437 = vmatprep.subr.bf16.mxu0 %v1604_v1 }
  0xe8   :  { %v183_v18 = vsel %vm178_vm2, %v177_v15, 0  ;;  %v1412_v19 = vpop.f32.mrb[7].mxu1 }
  0xe9   :  { %1420 = vmatpush3.bf16.xpose.msra.mxu1 %v183_v18  ;;  %v611_v18 = vsel %vm178_vm2, %v1556_v13, 0  ;;  %v1557_v19 = vld [vmem:[%s1900_s6 + $0x8] sm:$0xff]  }
  0xea   :  { %1431 = vmatprep.subr.bf16.mxu1 %v1604_v1 }
  0xf0   :  { %1422 = vmatmul.mubr.msk.bf16.vlgmr.msra.gmra.mrb[8].mxu1 %vm178_vm2, %v176_v20  ;;  %v614_v20 = vsel %vm178_vm2, %v1557_v19, 0 }
  0xf1   :  { %1433 = vmatprep.mubr.msk.bf16.mxu1 %vm1605_vm1, %v1604_v1  ;;  %1432 = vmatpush3.bf16.xpose.msra.mxu1 %v293_v33  ;;  %v1318_v33 = vld [vmem:[%s1897_s3 + $0x8] sm:$0xf] }
  0xf2   :  { %1443 = vmatprep.subr.bf16.mxu1 %v1604_v1 }
  0xf8   :  { %1434 = vmatmul.mubr.msk.bf16.vlgmr.msra.gmra.mrb[12].mxu1 %vm35_vm0, %v1670_v5 }
  0xf9   :  { %1445 = vmatprep.mubr.msk.bf16.mxu1 %vm1605_vm1, %v1604_v1  ;;  %1444 = vmatpush3.bf16.xpose.msra.mxu1 %v383_v47 }
  0xfa   :  { %1455 = vmatprep.subr.bf16.mxu1 %v1604_v1 }
 0x100   :  { %1446 = vmatmul.mubr.msk.bf16.vlgmr.msra.gmra.mrb[16].mxu1 %vm35_vm0, %v1694_v9 }
 0x101   :  { %1457 = vmatprep.mubr.msk.bf16.mxu1 %vm1605_vm1, %v1604_v1 }
 0x1c3   :  { %v219_v21 = vpop.f32.mrb[8].mxu1 }
 0x1c4   :  { %v1423_v22 = vpop.f32.mrb[9].mxu1  ;;  %v225_v23 = vsel %vm178_vm2, %v219_v21, -inf }
 0x1c5   :  { %226 = vmax.xlane.f32.xlu0 %v225_v23  ;;  %v222_v24 = vpop.f32.mrb[10].mxu1  ;;  %v1558_v23 = vld [vmem:[%s1900_s6 + $0x10] sm:$0xff]  }
 0x1c6   :  { %v1424_v25 = vpop.f32.mrb[11].mxu1  ;;  %v1320_v24 = vld [vmem:[%s1898_s4 + $0x8] sm:$0xf]  ;;  %v552_v27 = vsel %vm178_vm2, %v1558_v23, 0  ;;  %v1560_v23 = vld [vmem:[%s1900_s6 + $0x20] sm:$0xff]  }
 0x1c7   :  { %v704_v26 = vsel %vm35_vm0, %v1320_v24, 0  ;;  %v918_v24 = vsel %vm178_vm2, %v1560_v23, 0 }
 0x1cb   :  { %v329_v42 = vpop.f32.mrb[12].mxu1 }
 0x1cc   :  { %v1435_v43 = vpop.f32.mrb[13].mxu1  ;;  %v425_v58 = vpack.c.bf16 %v329_v42, %v329_v42 }
 0x1cd   :  { %v332_v44 = vpop.f32.mrb[14].mxu1 }
 0x1ce   :  { %v1436_v45 = vpop.f32.mrb[15].mxu1 }
 0x1d3   :  { %v419_v0 = vpop.f32.mrb[16].mxu1 }
 0x1d4   :  { %v483_v2 = vpack.c.bf16 %v419_v0, %v419_v0  ;;  %v1447_v3 = vpop.f32.mrb[17].mxu1 }
 0x1d5   :  { %v422_v4 = vpop.f32.mrb[18].mxu1 }
 0x1d6   :  { %v488_v7 = vsel %vm239_vm3, %v483_v2, 0  ;;  %v1448_v8 = vpop.f32.mrb[19].mxu1 }
 0x1d7   :  { %1456 = vmatpush3.bf16.msra.mxu1 %v488_v7 }
 0x1d8   :  { %1469 = vmatprep.subr.bf16.mxu1 %v1604_v1 }
 0x252   :  { %v227_v34 = vpop.xlane.xlu0 %226 }
 0x253   :  { %v228_v35 = vsub.f32 %v219_v21, %v227_v34 }
 0x255   :  { %v229_v36 = vmul.f32 1.442695, %v228_v35 }
 0x257   :  { %1564 = vpow2.f32 %v229_v36 }
 0x261   :  { %v1565_v38 = vpop.eup %1564 }
 0x262   :  { %v231_v39 = vsel %vm178_vm2, %v1565_v38, 0.0  ;;  %v234_v40 = vpack.c.bf16 %v1565_v38, %v1565_v38 }
 0x263   :  { %232 = vadd.xlane.f32.xlu1 %v231_v39  ;;  %v659_v39 = vsel %vm35_vm0, %v1318_v33, 0 }
 0x264   :  { %1428 = vmatmul.mubr.msk.bf16.vlgmr.msra.gmra.mrb[4].mxu0 %vm178_vm2, %v234_v40 }
 0x265   :  { %1438 = vmatpush3.bf16.xpose.msra.mxu0 %v338_v41  ;;  %1439 = vmatprep.mubr.msk.bf16.mxu0 %vm1605_vm1, %v1604_v1 }
 0x266   :  { %1449 = vmatprep.subr.bf16.mxu0 %v1604_v1 }
 0x26c   :  { %1440 = vmatmul.mubr.msk.bf16.vlgmr.msra.gmra.mrb[8].mxu0 %vm35_vm0, %v1680_v6 }
 0x26d   :  { %1451 = vmatprep.mubr.msk.bf16.mxu0 %vm1605_vm1, %v1604_v1 }
 0x2f0   :  { %v233_v14 = vpop.xlane.xlu1 %232 }
 0x337   :  { %v277_v48 = vpop.f32.mrb[4].mxu0 }
 0x338   :  { %v1429_v49 = vpop.f32.mrb[5].mxu0 }
 0x339   :  { %v280_v50 = vpop.f32.mrb[6].mxu0 }
 0x33a   :  { %v1430_v51 = vpop.f32.mrb[7].mxu0  ;;  %v1322_v50 = vld [vmem:[%s1899_s5 + $0x8] sm:$0xf] }
 0x33b   :  { %v749_v51 = vsel %vm35_vm0, %v1322_v50, 0 }
 0x33f   :  { %v374_v52 = vpop.f32.mrb[8].mxu0 }
 0x340   :  { %v426_v53 = vpack.c.bf16 %v374_v52, %v374_v52  ;;  %v1441_v54 = vpop.f32.mrb[9].mxu0 }
 0x341   :  { %v377_v55 = vpop.f32.mrb[10].mxu0 }
 0x342   :  { %v431_v56 = vsel %vm178_vm2, %v426_v53, 0  ;;  %v1442_v57 = vpop.f32.mrb[11].mxu0 }
 0x343   :  { %1450 = vmatpush3.bf16.xpose.msra.mxu0 %v431_v56 }
 0x344   :  { %1461 = vmatprep.subr.bf16.mxu0 %v1604_v1 }
 0x34a   :  { %1452 = vmatmul.mubr.msk.bf16.vlgmr.msra.gmra.mrb[12].mxu0 %vm178_vm2, %v425_v58 }
 0x34b   :  { %1465 = vmatprep.mubr.msk.bf16.mxu0 %vm1605_vm1, %v1604_v1  ;;  %1462 = vmatpush3.bf16.xpose.msra.mxu0 %v552_v27 }
 0x34c   :  { %1463 = vmatprep.subr.bf16.mxu0 %v1604_v1 }
 0x353   :  { %1464 = vmatpush3.bf16.xpose.msra.mxu0 %v555_v29 }
 0x354   :  { %1477 = vmatprep.subr.bf16.mxu0 %v1604_v1 }
 0x41d   :  { %v467_v59 = vpop.f32.mrb[12].mxu0 }
 0x41e   :  { %v1453_v60 = vpop.f32.mrb[13].mxu0  ;;  %v473_v61 = vsel %vm178_vm2, %v467_v59, -inf }
 0x41f   :  { %474 = vmax.xlane.f32.xlu0 %v473_v61  ;;  %v470_v62 = vpop.f32.mrb[14].mxu0 }
 0x420   :  { %v1454_v63 = vpop.f32.mrb[15].mxu0 }
 0x4ac   :  { %v475_v10 = vpop.xlane.xlu0 %474 }
 0x4ad   :  { %v476_v11 = vsub.f32 %v467_v59, %v475_v10 }
 0x4af   :  { %v477_v12 = vmul.f32 1.442695, %v476_v11 }
 0x4b1   :  { %1566 = vpow2.f32 %v477_v12 }
 0x4b2   :  { %1568 = vrcp.f32 %v233_v14 }
 0x4bb   :  { %v1567_v15 = vpop.eup %1566 }
 0x4bc   :  { %v479_v16 = vsel %vm178_vm2, %v1567_v15, 0.0  ;;  %v482_v17 = vpack.c.bf16 %v1567_v15, %v1567_v15  ;;  %v1569_v21 = vpop.eup %1568 }
 0x4bd   :  { %480 = vadd.xlane.f32.xlu1 %v479_v16  ;;  %v284_v22 = vmul.f32 %v1569_v21, %v277_v48  ;;  %v1333_v16 = vld [vmem:[%s1897_s3 + $0xc] sm:$0xf] }
 0x4be   :  { %1458 = vmatmul.mubr.msk.bf16.vlgmr.msra.gmra.mrb[20].mxu1 %vm178_vm2, %v482_v17  ;;  %v1335_v21 = vld [vmem:[%s1898_s4 + $0xc] sm:$0xf] }
 0x4bf   :  { %1470 = vmatpush3.bf16.xpose.msra.mxu1 %v611_v18  ;;  %1473 = vmatprep.mubr.msk.bf16.mxu1 %vm1605_vm1, %v1604_v1  ;;  %v285_v25 = vpack.c.bf16 %v284_v22, %v284_v22  ;;  %v1012_v22 = vsel %vm35_vm0, %v1335_v21, 0 }
 0x4c0   :  { %1471 = vmatprep.subr.bf16.mxu1 %v1604_v1 }
 0x4c7   :  { %1472 = vmatpush3.bf16.xpose.msra.mxu1 %v614_v20  ;;  %v967_v20 = vsel %vm35_vm0, %v1333_v16, 0 }
 0x4c8   :  { %1483 = vmatprep.subr.bf16.mxu1 %v1604_v1 }
 0x4ce   :  { %1474 = vmatmul.mubr.msk.bf16.vlgmr.msra.gmra.mrb[24].mxu1 %vm178_vm2, %v285_v25 }
 0x4cf   :  { %1484 = vmatpush3.bf16.xpose.msra.mxu1 %v704_v26  ;;  %1485 = vmatprep.mubr.msk.bf16.mxu1 %vm1605_vm1, %v1604_v1 }
 0x4d0   :  { %1495 = vmatprep.subr.bf16.mxu1 %v1604_v1 }
 0x4d6   :  { %1486 = vmatmul.mubr.msk.bf16.vlgmr.msra.gmra.mrb[28].mxu1 %vm35_vm0, %v1680_v6 }
 0x4d7   :  { %1497 = vmatprep.mubr.msk.bf16.mxu1 %vm1605_vm1, %v1604_v1 }
 0x54a   :  { %v481_v30 = vpop.xlane.xlu1 %480 }
 0x54b   :  { %1570 = vrcp.f32 %v481_v30 }
 0x555   :  { %v1571_v31 = vpop.eup %1570 }
 0x591   :  { %v524_v32 = vpop.f32.mrb[20].mxu1 }
 0x592   :  { %v531_v34 = vmul.f32 %v1571_v31, %v524_v32  ;;  %v1459_v35 = vpop.f32.mrb[21].mxu1 }
 0x593   :  { %v527_v36 = vpop.f32.mrb[22].mxu1 }
 0x594   :  { %v532_v37 = vpack.c.bf16 %v531_v34, %v531_v34  ;;  %v1460_v38 = vpop.f32.mrb[23].mxu1 }
 0x596   :  { %1466 = vmatmul.mubr.msk.bf16.vlgmr.msra.gmra.mrb[16].mxu0 %vm178_vm2, %v532_v37 }
 0x597   :  { %1478 = vmatpush3.bf16.xpose.msra.mxu0 %v659_v39  ;;  %1479 = vmatprep.mubr.msk.bf16.mxu0 %vm1605_vm1, %v1604_v1 }
 0x598   :  { %1489 = vmatprep.subr.bf16.mxu0 %v1604_v1 }
 0x59e   :  { %1480 = vmatmul.mubr.msk.bf16.vlgmr.msra.gmra.mrb[20].mxu0 %vm35_vm0, %v1670_v5 }
 0x59f   :  { %1491 = vmatprep.mubr.msk.bf16.mxu0 %vm1605_vm1, %v1604_v1  ;;  %1490 = vmatpush3.bf16.xpose.msra.mxu0 %v749_v51 }
 0x5a0   :  { %1501 = vmatprep.subr.bf16.mxu0 %v1604_v1 }
 0x5a1   :  { %v650_v40 = vpop.f32.mrb[24].mxu1 }
 0x5a2   :  { %v1475_v41 = vpop.f32.mrb[25].mxu1 }
 0x5a3   :  { %v653_v42 = vpop.f32.mrb[26].mxu1 }
 0x5a4   :  { %v1476_v43 = vpop.f32.mrb[27].mxu1 }
 0x5a6   :  { %1492 = vmatmul.mubr.msk.bf16.vlgmr.msra.gmra.mrb[24].mxu0 %vm35_vm0, %v1694_v9 }
 0x5a7   :  { %1503 = vmatprep.mubr.msk.bf16.mxu0 %vm1605_vm1, %v1604_v1 }
 0x5a9   :  { %v740_v44 = vpop.f32.mrb[28].mxu1 }
 0x5aa   :  { %v792_v45 = vpack.c.bf16 %v740_v44, %v740_v44  ;;  %v1487_v46 = vpop.f32.mrb[29].mxu1 }
 0x5ab   :  { %v743_v47 = vpop.f32.mrb[30].mxu1 }
 0x5ac   :  { %v797_v48 = vsel %vm178_vm2, %v792_v45, 0  ;;  %v1488_v49 = vpop.f32.mrb[31].mxu1 }
 0x5ad   :  { %1496 = vmatpush3.bf16.xpose.msra.mxu1 %v797_v48 }
 0x5ae   :  { %1507 = vmatprep.subr.bf16.mxu1 %v1604_v1 }
 0x669   :  { %v591_v52 = vpop.f32.mrb[16].mxu0 }
 0x66a   :  { %v1806_v53 = vadd.f32 %v650_v40, %v591_v52  ;;  %v1467_v54 = vpop.f32.mrb[17].mxu0 }
 0x66b   :  { %v594_v55 = vpop.f32.mrb[18].mxu0 }
 0x66c   :  { %v1468_v56 = vpop.f32.mrb[19].mxu0 }
 0x671   :  { %v695_v57 = vpop.f32.mrb[20].mxu0 }
 0x672   :  { %v791_v58 = vpack.c.bf16 %v695_v57, %v695_v57  ;;  %v1481_v59 = vpop.f32.mrb[21].mxu0 }
 0x673   :  { %v698_v60 = vpop.f32.mrb[22].mxu0 }
 0x674   :  { %v1482_v61 = vpop.f32.mrb[23].mxu0  ;;  %1498 = vmatmul.mubr.msk.bf16.vlgmr.msra.gmra.mrb[32].mxu1 %vm178_vm2, %v791_v58 }
 0x675   :  { %1511 = vmatprep.mubr.msk.bf16.mxu1 %vm1605_vm1, %v1604_v1  ;;  %1508 = vmatpush3.bf16.xpose.msra.mxu1 %v918_v24 }
 0x676   :  { %1509 = vmatprep.subr.bf16.mxu1 %v1604_v1 }
 0x679   :  { %v785_v4 = vpop.f32.mrb[24].mxu0 }
 0x67a   :  { %v849_v7 = vpack.c.bf16 %v785_v4, %v785_v4  ;;  %v1493_v8 = vpop.f32.mrb[25].mxu0  ;;  %v1562_v4 = vld [vmem:[%s1900_s6 + $0x30] sm:$0xff]  }
 0x67b   :  { %v788_v10 = vpop.f32.mrb[26].mxu0  ;;  %v1563_v8 = vld [vmem:[%s1900_s6 + $0x38] sm:$0xff]  }
 0x67c   :  { %v854_v11 = vsel %vm239_vm3, %v849_v7, 0  ;;  %v1494_v12 = vpop.f32.mrb[27].mxu0  ;;  %v1226_v7 = vsel %vm178_vm2, %v1562_v4, 0  ;;  %v1229_v10 = vsel %vm178_vm2, %v1563_v8, 0 }
 0x67d   :  { %1502 = vmatpush3.bf16.msra.mxu0 %v854_v11 }
 0x67e   :  { %1515 = vmatprep.subr.bf16.mxu0 %v1604_v1 }
 0x747   :  { %v833_v62 = vpop.f32.mrb[32].mxu1 }
 0x748   :  { %v1499_v63 = vpop.f32.mrb[33].mxu1  ;;  %v839_v0 = vsel %vm178_vm2, %v833_v62, -inf }
 0x749   :  { %840 = vmax.xlane.f32.xlu0 %v839_v0  ;;  %v836_v2 = vpop.f32.mrb[34].mxu1 }
 0x74a   :  { %v1500_v3 = vpop.f32.mrb[35].mxu1 }
 0x7d6   :  { %v841_v13 = vpop.xlane.xlu0 %840 }
 0x7d7   :  { %v842_v14 = vsub.f32 %v833_v62, %v841_v13 }
 0x7d9   :  { %v843_v15 = vmul.f32 1.442695, %v842_v14 }
 0x7db   :  { %1572 = vpow2.f32 %v843_v15 }
 0x7e5   :  { %v1573_v17 = vpop.eup %1572 }
 0x7e6   :  { %v845_v18 = vsel %vm178_vm2, %v1573_v17, 0.0  ;;  %v848_v19 = vpack.c.bf16 %v1573_v17, %v1573_v17 }
 0x7e7   :  { %846 = vadd.xlane.f32.xlu1 %v845_v18 }
 0x7e8   :  { %1504 = vmatmul.mubr.msk.bf16.vlgmr.msra.gmra.mrb[28].mxu0 %vm178_vm2, %v848_v19 }
 0x7e9   :  { %1516 = vmatpush3.bf16.xpose.msra.mxu0 %v967_v20  ;;  %1517 = vmatprep.mubr.msk.bf16.mxu0 %vm1605_vm1, %v1604_v1 }
 0x7ea   :  { %1521 = vmatprep.subr.bf16.mxu0 %v1604_v1 }
 0x7f0   :  { %1518 = vmatmul.mubr.msk.bf16.vlgmr.msra.gmra.mrb[32].mxu0 %vm35_vm0, %v1670_v5  ;;  %v1561_v5 = vld [vmem:[%s1900_s6 + $0x28] sm:$0xff]   ;;  %s1606_s6 = smov [#allocation2]  }
 0x7f1   :  { %1522 = vmatpush3.bf16.xpose.msra.mxu0 %v1012_v22  ;;  %1523 = vmatprep.mubr.msk.bf16.mxu0 %vm1605_vm1, %v1604_v1  ;;  %v921_v25 = vsel %vm178_vm2, %v1561_v5, 0  ;;  %s1287_s22 = sshll.u32 %s1606_s6, 4  ;;  %s1288_s22 = int_to_ptr.vmem [resolvable:$true] %s1287_s22 }
 0x7f2   :  { %1533 = vmatprep.subr.bf16.mxu0 %v1604_v1  ;;  %1510 = vmatpush3.bf16.xpose.msra.mxu1 %v921_v25  ;;  %s1580_s23 = scalar_lea.vmem %s1288_s22, 128  ;;  %p1585_p1 = scmp.lt.s32.totalorder %s1288_s22, %s1288_s22 }
 0x7f3   :  { %1527 = vmatprep.subr.bf16.mxu1 %v1604_v1  ;;  %p1581_p0 = scmp.ne.s32.totalorder %s1288_s22, %s1580_s23  ;;  %p1586_p2 = scmp.lt.s32.totalorder %s1580_s23, %s1580_s23 }
 0x7f5   :  { %p1587_p3 = por %p1586_p2, %p1585_p1 }
 0x7f7   :  { %p1588_p4 = pnand %p1587_p3, %p1581_p0 }
 0x7f8   :  { %1524 = vmatmul.mubr.msk.bf16.vlgmr.msra.gmra.mrb[36].mxu0 %vm35_vm0, %v1680_v6  ;;  %v1337_v6 = vld [vmem:[%s1899_s5 + $0xc] sm:$0xf] }
 0x7f9   :  { %1535 = vmatprep.mubr.msk.bf16.mxu0 %vm1605_vm1, %v1604_v1  ;;  %v1057_v34 = vsel %vm35_vm0, %v1337_v6, 0 }
 0x874   :  { %v847_v26 = vpop.xlane.xlu1 %846 }
 0x875   :  { %1574 = vrcp.f32 %v847_v26 }
 0x87f   :  { %v1575_v27 = vpop.eup %1574 }
 0x8bb   :  { %v890_v28 = vpop.f32.mrb[28].mxu0 }
 0x8bc   :  { %v897_v29 = vmul.f32 %v1575_v27, %v890_v28  ;;  %v1505_v30 = vpop.f32.mrb[29].mxu0 }
 0x8bd   :  { %v893_v31 = vpop.f32.mrb[30].mxu0 }
 0x8be   :  { %v898_v32 = vpack.c.bf16 %v897_v29, %v897_v29  ;;  %v1506_v33 = vpop.f32.mrb[31].mxu0 }
 0x8c0   :  { %1512 = vmatmul.mubr.msk.bf16.vlgmr.msra.gmra.mrb[36].mxu1 %vm178_vm2, %v898_v32 }
 0x8c1   :  { %1528 = vmatpush3.bf16.xpose.msra.mxu1 %v1057_v34  ;;  %1529 = vmatprep.mubr.msk.bf16.mxu1 %vm1605_vm1, %v1604_v1 }
 0x8c2   :  { %1539 = vmatprep.subr.bf16.mxu1 %v1604_v1 }
 0x8c3   :  { %v1003_v35 = vpop.f32.mrb[32].mxu0 }
 0x8c4   :  { %v1519_v36 = vpop.f32.mrb[33].mxu0  ;;  %v1099_v45 = vpack.c.bf16 %v1003_v35, %v1003_v35 }
 0x8c5   :  { %v1006_v37 = vpop.f32.mrb[34].mxu0 }
 0x8c6   :  { %v1520_v38 = vpop.f32.mrb[35].mxu0 }
 0x8c8   :  { %1530 = vmatmul.mubr.msk.bf16.vlgmr.msra.gmra.mrb[40].mxu1 %vm35_vm0, %v1694_v9 }
 0x8c9   :  { %1541 = vmatprep.mubr.msk.bf16.mxu1 %vm1605_vm1, %v1604_v1 }
 0x8cb   :  { %v1048_v39 = vpop.f32.mrb[36].mxu0 }
 0x8cc   :  { %v1100_v40 = vpack.c.bf16 %v1048_v39, %v1048_v39  ;;  %v1525_v41 = vpop.f32.mrb[37].mxu0 }
 0x8cd   :  { %v1051_v42 = vpop.f32.mrb[38].mxu0 }
 0x8ce   :  { %v1105_v43 = vsel %vm178_vm2, %v1100_v40, 0  ;;  %v1526_v44 = vpop.f32.mrb[39].mxu0 }
 0x8cf   :  { %1534 = vmatpush3.bf16.xpose.msra.mxu0 %v1105_v43 }
 0x8d0   :  { %1545 = vmatprep.subr.bf16.mxu0 %v1604_v1 }
 0x8d6   :  { %1536 = vmatmul.mubr.msk.bf16.vlgmr.msra.gmra.mrb[40].mxu0 %vm178_vm2, %v1099_v45 }
 0x8d7   :  { %1549 = vmatprep.mubr.msk.bf16.mxu0 %vm1605_vm1, %v1604_v1  ;;  %1546 = vmatpush3.bf16.xpose.msra.mxu0 %v1226_v7 }
 0x8d8   :  { %1547 = vmatprep.subr.bf16.mxu0 %v1604_v1  ;;  %v1348_v1 = vld [vmem:[%s1901_s7] ss:$0 sm:$0xff] }
 0x8df   :  { %1548 = vmatpush3.bf16.xpose.msra.mxu0 %v1229_v10 }
 0x993   :  { %v957_v9 = vpop.f32.mrb[36].mxu1 }
 0x994   :  { %v963_v46 = vadd.f32 %v957_v9, %v1806_v53  ;;  %v1513_v47 = vpop.f32.mrb[37].mxu1 }
 0x995   :  { %v960_v48 = vpop.f32.mrb[38].mxu1 }
 0x996   :  { %v1514_v49 = vpop.f32.mrb[39].mxu1 }
 0x99b   :  { %v1093_v56 = vpop.f32.mrb[40].mxu1 }
 0x99c   :  { %v1157_v57 = vpack.c.bf16 %v1093_v56, %v1093_v56  ;;  %v1531_v58 = vpop.f32.mrb[41].mxu1 }
 0x99d   :  { %v1096_v59 = vpop.f32.mrb[42].mxu1 }
 0x99e   :  { %v1162_v60 = vsel %vm239_vm3, %v1157_v57, 0  ;;  %v1532_v61 = vpop.f32.mrb[43].mxu1 }
 0x99f   :  { %1540 = vmatpush3.bf16.msra.mxu1 %v1162_v60 }
 0x9a9   :  { %v1141_v50 = vpop.f32.mrb[40].mxu0 }
 0x9aa   :  { %v1537_v51 = vpop.f32.mrb[41].mxu0  ;;  %v1147_v52 = vsel %vm178_vm2, %v1141_v50, -inf }
 0x9ab   :  { %1148 = vmax.xlane.f32.xlu0 %v1147_v52  ;;  %v1144_v54 = vpop.f32.mrb[42].mxu0 }
 0x9ac   :  { %v1538_v55 = vpop.f32.mrb[43].mxu0 }
 0xa38   :  { %v1149_v62 = vpop.xlane.xlu0 %1148 }
 0xa39   :  { %v1150_v53 = vsub.f32 %v1141_v50, %v1149_v62 }
 0xa3b   :  { %v1151_v63 = vmul.f32 1.442695, %v1150_v53 }
 0xa3d   :  { %1576 = vpow2.f32 %v1151_v63 }
 0xa47   :  { %v1577_v0 = vpop.eup %1576 }
 0xa48   :  { %v1153_v2 = vsel %vm178_vm2, %v1577_v0, 0.0  ;;  %v1156_v3 = vpack.c.bf16 %v1577_v0, %v1577_v0 }
 0xa49   :  { %1154 = vadd.xlane.f32.xlu1 %v1153_v2 }
 0xa4a   :  { %1542 = vmatmul.mubr.msk.bf16.vlgmr.msra.gmra.mrb[44].mxu1 %vm178_vm2, %v1156_v3 }
 0xad6   :  { %v1155_v11 = vpop.xlane.xlu1 %1154 }
 0xad7   :  { %1578 = vrcp.f32 %v1155_v11 }
 0xae1   :  { %v1579_v12 = vpop.eup %1578 }
 0xb1d   :  { %v1198_v13 = vpop.f32.mrb[44].mxu1 }
 0xb1e   :  { %v1205_v14 = vmul.f32 %v1579_v12, %v1198_v13  ;;  %v1543_v15 = vpop.f32.mrb[45].mxu1 }
 0xb1f   :  { %v1201_v16 = vpop.f32.mrb[46].mxu1 }
 0xb20   :  { %v1206_v17 = vpack.c.bf16 %v1205_v14, %v1205_v14  ;;  %v1544_v18 = vpop.f32.mrb[47].mxu1 }
 0xb22   :  { %1550 = vmatmul.mubr.msk.bf16.vlgmr.msra.gmra.mrb[44].mxu0 %vm178_vm2, %v1206_v17 }
 0xbf5   :  { %v1265_v19 = vpop.f32.mrb[44].mxu0 }
 0xbf6   :  { %v1271_v20 = vadd.f32 %v1265_v19, %v963_v46  ;;  %v1551_v21 = vpop.f32.mrb[45].mxu0 }
 0xbf7   :  { %v1268_v22 = vpop.f32.mrb[46].mxu0 }
 0xbf8   :  { %v1279_v23 = vadd.f32 %v1348_v1, %v1271_v20  ;;  %v1552_v24 = vpop.f32.mrb[47].mxu0 }
 0xbfa   :  { %1280 = vst.msk [vmem:[#allocation2] sm:$0xff] %vm35_vm0, %v1279_v23 }
 0xbfb   :  { %1591 = shalt.err (!%p1588_p4)
}
 0xbfc   :  { %s1592_s7 = scalar_lea.hbm %s1902_s8, 128 }
 0xbfd   :  { %p1593_p5 = scmp.ne.s32.totalorder %s1902_s8, %s1592_s7  ;;  %p1596_p6 = scmp.lt.u32.totalorder %s1592_s7, %s1902_s8 }
 0xbff   :  { %p1598_p7 = pnand %p1596_p6, %p1593_p5 }
 0xc01   :  { %1601 = shalt.err (!%p1598_p7)
}
 0xc02   :  { %1290 = dma.vmem_to_hbm [thread:$0]  %s1288_s22, 128, %s1902_s8, [#allocation3]  }
 0xc03   :  { %1602 = dma.done.wait [#allocation3], 128  }
 0xc04   :  { %1603 = vsyncadd [#allocation3], 4294967168 }
 0xc05   :  { %1294 = vsyncpa [#allocation3], 1 }

</bundles_post_ra>
